<compile_context>
chip_gen: v7x
topology: tpu7x:2x2x1
jax: 0.10.0
libtpu: 0.0.40
codegen_flags: <defaults>
</compile_context>

<pallas_src>
import math

import jax
import jax.numpy as jnp
from jax import lax
from jax.experimental import pallas as pl
from jax.experimental.pallas import tpu as pltpu


# ---------------------------------------------------------------------------
# Kernels
# ---------------------------------------------------------------------------

def _support_kernel(x_ref, w_ref, o_ref):
    # x_ref: (1, tr, f_in), w_ref: (f_in, f_out), o_ref: (1, tr, f_out)
    o_ref[0] = jnp.dot(x_ref[0], w_ref[...],
                       preferred_element_type=jnp.float32).astype(o_ref.dtype)


def _aggregate_kernel(lap_ref, s_ref, b_ref, o_ref):
    # lap_ref: (1, tm, tk), s_ref: (1, tk, f_out), b_ref: (1, f_out)
    # o_ref:   (1, tm, f_out) f32, resident across the k axis -> accumulate
    #          directly into it; bias is folded in at k == 0 (no scratch,
    #          no finalize copy).
    k = pl.program_id(2)

    @pl.when(k == 0)
    def _():
        o_ref[0] = jnp.broadcast_to(b_ref[...], o_ref.shape[1:])

    o_ref[0] += jnp.dot(lap_ref[0], s_ref[0],
                        preferred_element_type=jnp.float32)


# ---------------------------------------------------------------------------
# Tile planning
# ---------------------------------------------------------------------------

def _round_up(x, m):
    return ((x + m - 1) // m) * m


def _largest_aligned_divisor(n, pref, align):
    """Largest multiple of `align` that divides n and is <= pref (or None)."""
    best = None
    for cand in range(align, min(pref, n) + 1, align):
        if n % cand == 0:
            best = cand
    return best


def _plan_tiles(n, tm_pref, tk_pref):
    """Pick (tm, tk, n_pad): lap row tile, contraction tile, padded node count.

    tm must be a multiple of 8 (sublanes) and tk a multiple of 128 (lanes)
    unless the tile equals the full (possibly padded) node extent.  When no
    aligned divisor of n exists, zero-pad the node axis instead of collapsing
    to a full (N, N) lap block (which VMEM-OOMs for large awkward N,
    especially on v7x's 64 MiB VMEM).
    """
    tm = n if n <= tm_pref else _largest_aligned_divisor(n, tm_pref, 8)
    tk = n if n <= tk_pref else _largest_aligned_divisor(n, tk_pref, 128)
    if tm is not None and tk is not None:
        return tm, tk, n
    tm = _round_up(tm_pref, 8)
    tk = _round_up(tk_pref, 128)
    lcm = tm * tk // math.gcd(tm, tk)
    return tm, tk, _round_up(n, lcm)


# ---------------------------------------------------------------------------
# pallas_call wrappers
# ---------------------------------------------------------------------------

def _support_matmul(x, weight, *, tr, out_dtype):
    """support[b] = x[b] @ weight  -> (B, N, f_out), tiled over node rows."""
    B, n, f_in = x.shape
    f_out = weight.shape[1]
    n_r = n // tr
    flops = 2 * B * n * f_in * f_out
    bytes_accessed = (x.size * x.dtype.itemsize
                      + weight.size * weight.dtype.itemsize
                      + B * n * f_out * jnp.dtype(out_dtype).itemsize)
    return pl.pallas_call(
        _support_kernel,
        out_shape=jax.ShapeDtypeStruct((B, n, f_out), out_dtype),
        grid_spec=pltpu.PrefetchScalarGridSpec(
            num_scalar_prefetch=0,
            grid=(B, n_r),
            in_specs=[
                pl.BlockSpec((1, tr, f_in), lambda b, r: (b, r, 0)),
                pl.BlockSpec((f_in, f_out), lambda b, r: (0, 0)),
            ],
            out_specs=pl.BlockSpec((1, tr, f_out), lambda b, r: (b, r, 0)),
        ),
        compiler_params=pltpu.CompilerParams(
            dimension_semantics=("parallel", "parallel")),
        cost_estimate=pl.CostEstimate(flops=flops, transcendentals=0,
                                      bytes_accessed=bytes_accessed),
    )(x, weight)


def _aggregate_matmul(lap, support, bias2d, *, tm, tk):
    """out[b] = lap[b] @ support[b] + bias  -> (B, N, f_out) in f32."""
    B, n, _ = lap.shape
    f_out = support.shape[-1]
    n_m, n_k = n // tm, n // tk

    lap_elt = lap.dtype.itemsize
    sup_elt = support.dtype.itemsize
    flops = 2 * B * n * n * f_out
    bytes_accessed = (lap.size * lap_elt
                      + support.size * sup_elt * n_m  # support re-read per row tile
                      + B * n * f_out * 4 + f_out * 4)
    # Double-buffered lap / support / out blocks + slack; clamp so it is safe
    # on v7x (64 MiB physical) while never shrinking below the 32 MiB default.
    vmem_need = 2 * (tm * tk * lap_elt + tk * f_out * sup_elt + tm * f_out * 4)
    vmem_limit = int(min(max(2 * vmem_need, 32 << 20), 64 << 20))

    return pl.pallas_call(
        _aggregate_kernel,
        out_shape=jax.ShapeDtypeStruct((B, n, f_out), jnp.float32),
        grid_spec=pltpu.PrefetchScalarGridSpec(
            num_scalar_prefetch=0,
            grid=(B, n_m, n_k),
            in_specs=[
                pl.BlockSpec((1, tm, tk), lambda b, m, k: (b, m, k)),
                pl.BlockSpec((1, tk, f_out), lambda b, m, k: (b, k, 0)),
                pl.BlockSpec((1, f_out), lambda b, m, k: (0, 0)),
            ],
            out_specs=pl.BlockSpec((1, tm, f_out), lambda b, m, k: (b, m, 0)),
        ),
        compiler_params=pltpu.CompilerParams(
            dimension_semantics=("parallel", "parallel", "arbitrary"),
            vmem_limit_bytes=vmem_limit),
        cost_estimate=pl.CostEstimate(flops=flops, transcendentals=0,
                                      bytes_accessed=bytes_accessed),
    )(lap, support, bias2d)


def batch_graph_convolution(x, lap, weight, bias=None, *,
                            tm_pref=512, tk_pref=1024, mxu_dtype=None):
    """out = lap @ (x @ weight) + bias.

    x: (B, N, f_in); lap: (B, N, N); weight: (f_in, f_out); bias: (f_out,) or
    None (the module's bias=False case).  mxu_dtype=jnp.bfloat16 feeds the MXU
    bf16 lap/support operands with f32 accumulation (faster, lower precision).
    """
    B, N, f_in = x.shape
    f_out = weight.shape[1]
    out_dtype = x.dtype

    if bias is None:
        bias = jnp.zeros((f_out,), jnp.float32)
    bias2d = bias.reshape(1, f_out).astype(jnp.float32)

    tm, tk, n_pad = _plan_tiles(N, tm_pref, tk_pref)
    if n_pad != N:
        # Zero padding is exact: padded lap rows/cols and x rows contribute 0.
        x = jnp.pad(x, ((0, 0), (0, n_pad - N), (0, 0)))
        lap = jnp.pad(lap, ((0, 0), (0, n_pad - N), (0, n_pad - N)))

    sup_dtype = out_dtype if mxu_dtype is None else mxu_dtype
    lap_mxu = lap if mxu_dtype is None else lap.astype(mxu_dtype)

    # Stage 1 (hoisted): support = x @ W, computed exactly once per node row.
    support = _support_matmul(x, weight, tr=tk, out_dtype=sup_dtype)

    # Stage 2: out = lap @ support + bias, f32 accumulation over the node axis.
    out = _aggregate_matmul(lap_mxu, support, bias2d, tm=tm, tk=tk)

    if n_pad != N:
        out = out[:, :N, :]
    return out.astype(out_dtype)


# ---------------------------------------------------------------------------
# Reference + self-test
# ---------------------------------------------------------------------------

def reference(x, lap, weight, bias):
    """Pure-JAX reference mirroring the PyTorch forward (full f32 precision)."""
    support = jnp.einsum("bnf,fo->bno", x, weight,
                         precision=lax.Precision.HIGHEST)
    out = jnp.einsum("bnm,bmo->bno", lap, support,
                     precision=lax.Precision.HIGHEST)
    return out + bias[None, None, :]


def _make_inputs(key, B, N, f_in, f_out):
    kx, kl, kw, kb = jax.random.split(key, 4)
    x = jax.random.normal(kx, (B, N, f_in), dtype=jnp.float32)
    lap = jax.random.normal(kl, (B, N, N), dtype=jnp.float32) / math.sqrt(N)
    # Xavier-uniform weight init (matches nn.init.xavier_uniform_).
    bound = math.sqrt(6.0 / (f_in + f_out))
    weight = jax.random.uniform(kw, (f_in, f_out), minval=-bound, maxval=bound,
                                dtype=jnp.float32)
    # Module inits bias to zero; use a small nonzero bias to exercise the add.
    bias = 0.1 * jax.random.normal(kb, (f_out,), dtype=jnp.float32)
    return x, lap, weight, bias


def _check(out, ref, atol, rtol, name):
    assert out.shape == ref.shape, (name, out.shape, ref.shape)
    ok = jnp.allclose(out, ref, atol=atol, rtol=rtol)
    assert ok, f"{name}: max abs err = {float(jnp.max(jnp.abs(out - ref)))}"


if __name__ == "__main__":
    key = jax.random.PRNGKey(0)
    k1, k2, k3 = jax.random.split(key, 3)
    f_in, f_out = 32, 128

    # 1) Small single-tile case consistent with the module (B=2, N=16):
    #    grid collapses to (2, 1, 1).
    x, lap, w, b = _make_inputs(k1, 2, 16, f_in, f_out)
    out = jax.block_until_ready(batch_graph_convolution(x, lap, w, b))
    _check(out, reference(x, lap, w, b), 1e-3, 1e-3, "small")

    # 2) Multi-tile grid (2, 2, 2): exercises k-axis accumulation / bias init
    #    and multiple output-row tiles (previously untested path).
    x, lap, w, b = _make_inputs(k2, 2, 256, f_in, f_out)
    out = jax.block_until_ready(
        batch_graph_convolution(x, lap, w, b, tm_pref=128, tk_pref=128))
    _check(out, reference(x, lap, w, b), 1e-3, 1e-3, "multi-tile")

    # 3) Non-divisible N: exercises the zero-padding fallback (N=200 -> 256).
    x, lap, w, b = _make_inputs(k3, 2, 200, f_in, f_out)
    out = jax.block_until_ready(
        batch_graph_convolution(x, lap, w, b, tm_pref=128, tk_pref=128))
    _check(out, reference(x, lap, w, b), 1e-3, 1e-3, "padded")

    # 4) bf16 MXU operands with f32 accumulation (looser tolerance).
    x, lap, w, b = _make_inputs(k2, 2, 256, f_in, f_out)
    out = jax.block_until_ready(
        batch_graph_convolution(x, lap, w, b, tm_pref=128, tk_pref=128,
                                mxu_dtype=jnp.bfloat16))
    _check(out, reference(x, lap, w, b), 5e-2, 5e-2, "bf16-mxu")

    print("KERNEL_OK")
</pallas_src>

<mosaic_0001>
module attributes {stable_mosaic.version = 11 : i64} {
  func.func @_support_kernel(%arg0: i32, %arg1: i32, %arg2: memref<1x16x32xf32, #tpu.memory_space<vmem>>, %arg3: memref<32x128xf32, #tpu.memory_space<vmem>>, %arg4: memref<1x16x128xf32, #tpu.memory_space<vmem>>) attributes {dimension_semantics = [#tpu.dimension_semantics<parallel>, #tpu.dimension_semantics<parallel>], iteration_bounds = array<i64: 2, 1>, scalar_prefetch = 0 : i64, scratch_operands = 0 : i64, tpu.core_type = #tpu.core_type<tc>, window_params = [{transform_indices = @transform_0, window_bounds = array<i64: 1, 16, 32>}, {pipeline_mode = #tpu.pipeline_mode<synchronous>, transform_indices = @transform_1, window_bounds = array<i64: 32, 128>}, {transform_indices = @transform_2, window_bounds = array<i64: 1, 16, 128>}]} {
    %c0 = arith.constant 0 : index
    %c0_0 = arith.constant 0 : index
    %c0_1 = arith.constant 0 : index
    %0 = vector.load %arg2[%c0, %c0_0, %c0_1] : memref<1x16x32xf32, #tpu.memory_space<vmem>>, vector<1x16x32xf32>
    %1 = vector.shape_cast %0 : vector<1x16x32xf32> to vector<16x32xf32>
    %c0_2 = arith.constant 0 : index
    %c0_3 = arith.constant 0 : index
    %2 = vector.load %arg3[%c0_2, %c0_3] : memref<32x128xf32, #tpu.memory_space<vmem>>, vector<32x128xf32>
    %cst = arith.constant dense<0.000000e+00> : vector<16x128xf32>
    %3 = tpu.matmul %1, %2, %cst {dimension_numbers = #tpu.dot_dimension_numbers<[1], [0], [0], [1], [0, 0, 1, 1], [], []>} : vector<16x32xf32>, vector<32x128xf32>, vector<16x128xf32> -> vector<16x128xf32>
    %c0_4 = arith.constant 0 : index
    %c0_5 = arith.constant 0 : index
    %c0_6 = arith.constant 0 : index
    %4 = vector.load %arg4[%c0_4, %c0_5, %c0_6] : memref<1x16x128xf32, #tpu.memory_space<vmem>>, vector<1x16x128xf32>
    %5 = vector.shape_cast %4 : vector<1x16x128xf32> to vector<16x128xf32>
    %6 = vector.shape_cast %3 : vector<16x128xf32> to vector<1x16x128xf32>
    tpu.vector_store %arg4[%c0_4, %c0_5, %c0_6], %6 {strides = array<i32>} : memref<1x16x128xf32, #tpu.memory_space<vmem>>, vector<1x16x128xf32>,
    return
  }
  func.func @transform_0(%arg0: i32, %arg1: i32) -> (i32, i32, i32) {
    %c0_i32 = arith.constant 0 : i32
    %c0_i32_0 = arith.constant 0 : i32
    return %arg0, %arg1, %c0_i32 : i32, i32, i32
  }
  func.func @transform_1(%arg0: i32, %arg1: i32) -> (i32, i32) {
    %c0_i32 = arith.constant 0 : i32
    %c0_i32_0 = arith.constant 0 : i32
    %c0_i32_1 = arith.constant 0 : i32
    return %c0_i32, %c0_i32_0 : i32, i32
  }
  func.func @transform_2(%arg0: i32, %arg1: i32) -> (i32, i32, i32) {
    %c0_i32 = arith.constant 0 : i32
    %c0_i32_0 = arith.constant 0 : i32
    return %arg0, %arg1, %c0_i32 : i32, i32, i32
  }
}

</mosaic_0001>

<bundles_post_ra>
// kernel: tpu_custom_call.1
= control target key start
LH: loop header
LB: loop body
LE: loop exit
PB: predicated region body
PF: predicated region fallthrough
CT: control target
= control target key end

     0   :  { %7 = vsyncpa [#allocation3], 0  ;;  %s916_s0 = inlined_call_operand.hbm [shape: f32[2,16,32], index: 0, kind: input, shape index: {}]   ;;  %s917_s1 = inlined_call_operand.hbm [shape: f32[32,128], index: 1, kind: input, shape index: {}]   ;;  %s918_s2 = inlined_call_operand.hbm [shape: f32[2,16,128], index: 2, kind: output, shape index: {}]  }
   0x1   :  { %9 = vsyncpa [#allocation3 + $0x1], 0 }
   0x2   :  { %10 = vsyncpa [#allocation6], 0 }
   0x3   :  { %11 = vsyncpa [#allocation4], 0 }
   0x4   :  { %13 = vsyncpa [#allocation4 + $0x1], 0  ;;  %s691_s9 = smov 0   ;;  %s693_s10 = smov 0  }
   0x5   :  { %s695_s11 = smov 0   ;;  %s697_s12 = smov 0  }
   0x6   :  { %s699_s13 = smov 0   ;;  %s701_s14 = smov 0  }
   0x7 LB: > { %s400_s15 = sadd.s32 4294967295, %s667_s14   ;;  %s401_s16 = sadd.s32 4294967294, %s667_s14   ;;  %s667_s14 = sphi %s701_s14, %s19_s14   ;;  %s663_s13 = sphi %s699_s13, %s942_s13   ;;  %s659_s12 = sphi %s697_s12, %s941_s12   ;;  %s655_s11 = sphi %s695_s11, %s940_s11   ;;  %s651_s10 = sphi %s693_s10, %s939_s10   ;;  %s647_s9 = sphi %s691_s9, %s938_s9  }
   0x8   : > { %p53_p0 = scmp.ne.s32.totalorder %s651_s10, %s647_s9  ;;  %p725_p1 = scmp.eq.s32.totalorder %s400_s15, 0 }
   0x9   : > { %p729_p2 = scmp.eq.s32.totalorder %s400_s15, 1  ;;  %p106_p3 = scmp.eq.s32.totalorder %s401_s16, 1 }
   0xa   : > { %s923_s17 = scalar_select %p725_p1, 1, 0 }
   0xb   : > { %s924_s18 = scalar_select %p729_p2, 1, 0 }
   0xc   : > { %p735_p4 = por %p725_p1, %p53_p0  ;;  %p402_p5 = scmp.ge.s32.totalorder %s667_s14, 1 }
   0xd   : > { %p740_p6 = por %p106_p3, %p53_p0  ;;  %p113_p7 = scmp.lt.s32.totalorder %s667_s14, 3 }
   0xe   : > { %s925_s19 = scalar_select %p735_p4, 1, 0 }
   0xf   : > { %s926_s20 = scalar_select %p740_p6, 1, 0 }
  0x10   : > { %p745_p8 = pnand %p402_p5, %p113_p7  ;;  %s669_s22 = smov [#allocation5]  }
  0x11   : > { %s125_s23 = sshll.u32 %s669_s22, 4  ;;  %s31_s25 = sadd.s32 1, %s663_s13  ;;  %s126_s23 = int_to_ptr.vmem [resolvable:$true] %s125_s23 }
  0x12   : > { %s927_s21 = scalar_select %p745_p8, 1, 0 }
  0x13   : > { %p454_p9 = pneg %p745_p8  ;;  %s523_s28 = scalar_lea.hbm %s917_s1, 512 }
  0x14   : > { %p524_p12 = scmp.ne.s32.totalorder %s917_s1, %s523_s28  ;;  %p530_p5 = scmp.lt.u32.totalorder %s523_s28, %s917_s1 }
  0x15   : > { %p754_p11 = pnand %p454_p9, %p725_p1 }
  0x17   : > { %p525_p13 = pneg %p754_p11 }
  0x19   : > { %p526_p0 = pnand %p525_p13, %p524_p12 }
  0x1b   : > { %p527_p3 = pneg %p526_p0 }
  0x1d   : > { %p532_p7 = pnand %p530_p5, %p527_p3 }
  0x1f   : > { %535 = shalt.err (!%p532_p7)
}
  0x20   : > { %s536_s5 = scalar_lea.vmem %s126_s23, 512  ;;  %p544_p1 = scmp.lt.s32.totalorder %s126_s23, %s126_s23 }
  0x21   : > { %p537_p9 = scmp.ne.s32.totalorder %s126_s23, %s536_s5  ;;  %p545_p4 = scmp.lt.s32.totalorder %s536_s5, %s536_s5 }
  0x23   : > { %p539_p10 = pnand %p537_p9, %p525_p13  ;;  %p546_p8 = por %p545_p4, %p544_p1 }
  0x25   : > { %p540_p6 = pneg %p539_p10 }
  0x27   : > { %p547_p2 = pnand %p546_p8, %p540_p6 }
  0x29   : > { %550 = shalt.err (!%p547_p2)
}
  0x2a   : > { %s670_s6 = smov 128   ;;  %s671_s7 = smov 8  }
  0x2b   : > { %457 = dma.hbm_to_vmem [thread:$0]  (!%p754_p11), %s917_s1, 512, %s126_s23, [#allocation6], %s670_s6, %s670_s6, %s671_s7  }
  0x2c   : > { %p33_p1 = scmp.ge.s32.totalorder %s31_s25, 2  ;;  %s40_s16 = sadd.s32 1, %s655_s11 }
  0x2d   : > { %p47_p2 = scmp.ne.s32.totalorder %s655_s11, %s651_s10  ;;  %p48_p4 = scmp.eq.s32.totalorder %s667_s14, 0 }
  0x2e   : > { %s944_s25 = smov (%p33_p1, %s31_s25), 0  ;;  %p930_p8 = scmp.ne.s32.totalorder %s924_s18, 0 }
  0x2f   : > { %p784_p6 = por %p48_p4, %p47_p2  ;;  %s35_s26 = ssub.s32 %s663_s13, %s944_s25 }
  0x30   : > { %p790_p10 = por %p930_p8, %p47_p2  ;;  %p467_p12 = scmp.lt.s32.totalorder %s667_s14, 2 }
  0x31   : > { %p38_p11 = scmp.eq.s32.totalorder %s35_s26, 0  ;;  %s139_s23 = sand.u32 1, %s655_s11  }
  0x32   : > { %s405_s27 = sshll.u32 %s139_s23, 4  ;;  %s419_s29 = sshll.u32 %s663_s13, 8 }
  0x33   : > { %s799_s28 = scalar_select %p38_p11, %s655_s11, %s40_s16  }
  0x34   : > { %s805_s4 = scalar_lea.hbm %s916_s0, %s419_s29  ;;  %s143_s18 = scalar_lea.vmem [#allocation2], %s405_s27 }
  0x35   : > { %s152_s5 = sshll.u32 %s143_s18, 4  ;;  %p811_p13 = pnand %p467_p12, %p784_p6  ;;  %s807_s5 = int_to_ptr.vmem [resolvable:$true] %s152_s5 }
  0x36   : > { %s815_s15 = scalar_lea.sflag [#allocation3], %s139_s23  ;;  %s551_s16 = scalar_lea.hbm %s805_s4, 256 }
  0x37   : > { %p552_p0 = scmp.ne.s32.totalorder %s805_s4, %s551_s16  ;;  %p553_p3 = pneg %p811_p13 }
  0x38   : > { %s556_s22 = scalar_lea.hbm %s916_s0, 512  ;;  %p557_p9 = scmp.lt.u32.totalorder %s805_s4, %s916_s0 }
  0x39   : > { %p554_p5 = pnand %p553_p3, %p552_p0  ;;  %p558_p1 = scmp.lt.u32.totalorder %s556_s22, %s551_s16 }
  0x3a   : > { %p560_p4 = scmp.lt.u32.totalorder %s551_s16, %s805_s4 }
  0x3b   : > { %p555_p7 = pneg %p554_p5  ;;  %p559_p2 = por %p558_p1, %p557_p9 }
  0x3d   : > { %p561_p6 = por %p560_p4, %p559_p2 }
  0x3f   : > { %p562_p8 = pnand %p561_p6, %p555_p7 }
  0x41   : > { %565 = shalt.err (!%p562_p8)
}
  0x42   : > { %s566_s23 = scalar_lea.vmem %s807_s5, 256  ;;  %s672_s3 = smov [#allocation2]  }
  0x43   : > { %p567_p12 = scmp.ne.s32.totalorder %s807_s5, %s566_s23  ;;  %s571_s18 = sshll.u32 %s672_s3, 4  ;;  %s572_s18 = int_to_ptr.vmem [resolvable:$false] %s571_s18 }
  0x44   : > { %s573_s26 = scalar_lea.vmem %s572_s18, 512  ;;  %p574_p5 = scmp.lt.s32.totalorder %s807_s5, %s572_s18 }
  0x45   : > { %p569_p11 = pnand %p567_p12, %p553_p3  ;;  %p575_p9 = scmp.lt.s32.totalorder %s573_s26, %s566_s23 }
  0x47   : > { %p570_p0 = pneg %p569_p11  ;;  %p576_p1 = por %p575_p9, %p574_p5 }
  0x49   : > { %p577_p2 = pnand %p576_p1, %p570_p0 }
  0x4b   : > { %580 = shalt.err (!%p577_p2)
}
  0x4c   : > { %461 = dma.hbm_to_vmem [thread:$0]  (!%p811_p13), %s805_s4, 256, %s807_s5, %s815_s15, %s670_s6, %s670_s6, %s671_s7  }
  0x4d   : > { %p933_p3 = scmp.ne.s32.totalorder %s927_s21, 0 }
  0x4e   : > { %s849_s16 = sand.u32 (!%p933_p3), 1, %s651_s10   ;;  %p934_p7 = scmp.ne.s32.totalorder (!%p933_p3), %s925_s19, 0 }
  0x4f   : > { %164 = sbr.rel (%p933_p3) target bundleno = 329 (0x149), region = 28  ;;  %s409_s27 = sshll.u32 (!%p933_p3), %s849_s16, 4 }
  0x50   : > { %s167_s22 = scalar_lea.sflag (!%p933_p3), [#allocation3], %s849_s16  ;;  %s170_s29 = scalar_lea.vmem (!%p933_p3), [#allocation2], %s409_s27 }
  0x56   : > { %634 = dma.done.wait (%p934_p7), %s167_s22, 256  }
  0x57   : > { %636 = vsyncadd (%p934_p7), %s167_s22, 4294967040  ;;  %p935_p4 = scmp.ne.s32.totalorder %s923_s17, 0 }
  0x59   : > { %638 = dma.done.wait (%p935_p4), [#allocation6], 512  }
  0x5a   : > { %640 = vsyncadd (%p935_p4), [#allocation6], 4294966784  ;;  %vm203_vm0 = vcmask 261120   ;;  %v199_v0 = vld [vmem:[#allocation5] sm:$0xff]  ;;  %v200_v1 = vld [vmem:[#allocation5 + $0x8] sm:$0xff]  ;;  %s194_s17 = scalar_lea.vmem [#allocation7], %s409_s27 }
  0x5b   : > { %v201_v2 = vld [vmem:[#allocation5 + $0x10] sm:$0xff]  ;;  %v438_v3 = vpack.c.bf16 %v200_v1, %v199_v0  ;;  %v202_v4 = vld [vmem:[#allocation5 + $0x18] sm:$0xff]  ;;  %s303_s19 = sshll.u32 %s194_s17, 4  ;;  %s420_s21 = sshll.u32 %s659_s12, 8  ;;  %s862_s19 = int_to_ptr.vmem [resolvable:$true] %s303_s19 }
  0x5c   : > { %v197_v5 = vld [vmem:[%s170_s29] sm:$0xff]  ;;  %v442_v6 = vpack.c.bf16 %v202_v4, %v201_v2  ;;  %v198_v7 = vld [vmem:[%s170_s29 + $0x8] sm:$0xff]  ;;  %s867_s4 = scalar_lea.hbm %s918_s2, %s420_s21  ;;  %s288_s5 = scalar_lea.sflag [#allocation4], %s849_s16 }
  0x5d   : > { %435 = vmatprep.mubr.msk.f32.mxu0 %vm203_vm0, %v197_v5  ;;  %439 = vmatprep.subr.bf16.mxu0 %v438_v3  ;;  %s581_s8 = scalar_lea.vmem %s862_s19, 256  ;;  %s673_s12 = smov [#allocation7]  }
  0x5e   : > { %441 = vmatpush3.bf16.msra.mxu0 %v438_v3  ;;  %p582_p13 = scmp.ne.s32.totalorder %s862_s19, %s581_s8  ;;  %s585_s15 = sshll.u32 %s673_s12, 4  ;;  %s586_s15 = int_to_ptr.vmem [resolvable:$false] %s585_s15 }
  0x5f   : > { %443 = vmatprep.subr.bf16.mxu0 %v442_v6  ;;  %s587_s30 = scalar_lea.vmem %s586_s15, 512  ;;  %p588_p12 = scmp.lt.s32.totalorder %s862_s19, %s586_s15 }
  0x60   : > { %p583_p6 = pnand %p582_p13, %p790_p10  ;;  %p589_p11 = scmp.lt.s32.totalorder %s587_s30, %s581_s8 }
  0x62   : > { %445 = vmatpush3.bf16.msra.mxu0 %v442_v6  ;;  %p584_p8 = pneg %p583_p6  ;;  %p590_p0 = por %p589_p11, %p588_p12 }
  0x64   : > { %p591_p5 = pnand %p590_p0, %p584_p8 }
  0x65   : > { %436 = vmatmul.mubr.msk.f32.vlgmr.msra.gmra.mrb[0].mxu0 %vm203_vm0, %v198_v7 }
 0x138   : > { %v437_v8 = vpop.f32.mrb[0].mxu0 }
 0x139   : > { %286 = vst [vmem:[%s194_s17 + $0x8] sm:$0xff] %v437_v8  ;;  %v276_v9 = vpop.f32.mrb[1].mxu0 }
 0x13a   : > { %285 = vst [vmem:[%s194_s17] sm:$0xff] %v276_v9 }
 0x13b   : > { %594 = shalt.err (!%p591_p5)
}
 0x13c   : > { %s595_s23 = scalar_lea.hbm %s867_s4, 256  ;;  %s599_s26 = scalar_lea.hbm %s918_s2, 512 }
 0x13d   : > { %p596_p9 = scmp.ne.s32.totalorder %s867_s4, %s595_s23  ;;  %p600_p3 = scmp.lt.u32.totalorder %s867_s4, %s918_s2 }
 0x13e   : > { %p601_p7 = scmp.lt.u32.totalorder %s599_s26, %s595_s23  ;;  %p603_p13 = scmp.lt.u32.totalorder %s595_s23, %s867_s4 }
 0x13f   : > { %p597_p1 = pnand %p596_p9, %p790_p10 }
 0x140   : > { %p602_p4 = por %p601_p7, %p600_p3 }
 0x141   : > { %p598_p2 = pneg %p597_p1 }
 0x142   : > { %p604_p6 = por %p603_p13, %p602_p4 }
 0x144   : > { %p605_p8 = pnand %p604_p6, %p598_p2 }
 0x146   : > { %608 = shalt.err (!%p605_p8)
}
 0x147   : > { %s674_s29 = smov 128   ;;  %s675_s17 = smov 8  }
 0x148   : > { %452 = dma.vmem_to_hbm [thread:$0]  (%p790_p10), %s862_s19, 256, %s867_s4, %s288_s5, %s674_s29, %s674_s29, %s675_s17  }
 0x149 PF: > { %s318_s21 = sand.u32 1, %s647_s9   ;;  %p936_p12 = scmp.ne.s32.totalorder %s926_s20, 0 }
 0x14a   : > { %p937_p11 = scmp.ge.s32.totalorder %s667_s14, 2  ;;  %s319_s6 = scalar_lea.sflag [#allocation4], %s318_s21 }
 0x14c   : > { %p463_p0 = pnand %p937_p11, %p936_p12 }
 0x14e   : > { %642 = dma.done.wait (!%p463_p0), %s319_s6, 256  }
 0x14f   : > { %644 = vsyncadd (!%p463_p0), %s319_s6, 4294967040  ;;  %s19_s14 = sadd.s32 1, %s667_s14   ;;  %s938_s9 = smov %s651_s10 }
 0x150   : > { %p16_p5 = scmp.ge.s32.totalorder %s19_s14, 4   ;;  %s939_s10 = smov %s655_s11 }
 0x151   : > { %s940_s11 = smov %s799_s28  ;;  %s941_s12 = smov %s663_s13 }
 0x152   : > { %s942_s13 = smov %s944_s25  ;;  %18 = sbr.rel (!%p16_p5) target bundleno = 7 (0x7), region = 77 }
 0x159   :  { %324 = vsyncpa [#allocation3], 1 }
 0x15a   :  { %326 = vsyncpa [#allocation3 + $0x1], 1 }
 0x15b   :  { %327 = vsyncpa [#allocation6], 1 }
 0x15c   :  { %328 = vsyncpa [#allocation4], 1 }
 0x15d   :  { %330 = vsyncpa [#allocation4 + $0x1], 1 }

</bundles_post_ra>
